<compile_context>
chip_gen: v6e
topology: v6e:2x2x1
jax: 0.10.0
libtpu: 0.0.40
codegen_flags: <defaults>
</compile_context>

<pallas_src>
import jax
import jax.numpy as jnp
from jax import lax
from jax.experimental import pallas as pl
from jax.experimental.pallas import tpu as pltpu
import numpy as np

NEG_INF = -1e30     # additive mask value
LANE = 128          # lane width / default row & column tile


def _vmem_limit(*block_bytes, headroom=16 * 1024 * 1024):
    # double-buffered blocks + headroom for in-kernel temporaries, clamped
    # safely below v7x's 64 MiB physical VMEM.
    return int(min(sum(2 * b for b in block_bytes) + headroom, 48 * 1024 * 1024))


# --------------------------- lin1 + relu ------------------------------------
def lin_relu_kernel(x_ref, w_ref, b_ref, o_ref):
    o_ref[...] = jnp.maximum(
        jnp.dot(x_ref[...], w_ref[...], preferred_element_type=jnp.float32)
        + b_ref[...], 0.0).astype(o_ref.dtype)


def lin_relu(x, w_t, b, *, tile_rows=LANE):
    n, f = x.shape
    h = w_t.shape[1]
    return pl.pallas_call(
        lin_relu_kernel,
        out_shape=jax.ShapeDtypeStruct((n, h), jnp.float32),
        grid_spec=pltpu.PrefetchScalarGridSpec(
            num_scalar_prefetch=0,
            grid=(n // tile_rows,),
            in_specs=[pl.BlockSpec((tile_rows, f), lambda i: (i, 0)),
                      pl.BlockSpec((f, h), lambda i: (0, 0)),
                      pl.BlockSpec((1, h), lambda i: (0, 0))],
            out_specs=pl.BlockSpec((tile_rows, h), lambda i: (i, 0))),
        compiler_params=pltpu.CompilerParams(
            dimension_semantics=("parallel",),
            vmem_limit_bytes=_vmem_limit(tile_rows * f * 4, f * h * 4,
                                         h * 4, tile_rows * h * 4)),
        cost_estimate=pl.CostEstimate(
            flops=int(2 * n * f * h),
            transcendentals=0,
            bytes_accessed=int(4 * (n * f + f * h + h + n * h))),
    )(x, w_t, b)


# --------------------- AGNN propagation (flash-style) -----------------------
def agnn_prop_kernel(beta_ref, q_ref, kv_ref, bias_ref, o_ref,
                     m_sc, l_sc, acc_sc):
    j = pl.program_id(1)

    @pl.when(j == 0)
    def _():
        m_sc[...] = jnp.full_like(m_sc, -jnp.inf)
        l_sc[...] = jnp.zeros_like(l_sc)
        acc_sc[...] = jnp.zeros_like(acc_sc)

    beta = beta_ref[0, 0]
    fq = q_ref[...]
    fk = kv_ref[...]

    # L2-normalize rows with rsqrt (EUP slot); fold beta into the query side so
    # the scaling is a [TR,H] multiply instead of a [TR,TC] one.
    inv_q = lax.rsqrt(jnp.maximum(jnp.sum(fq * fq, axis=-1, keepdims=True), 1e-24))
    inv_k = lax.rsqrt(jnp.maximum(jnp.sum(fk * fk, axis=-1, keepdims=True), 1e-24))
    qn = (fq * (inv_q * beta)).astype(jnp.bfloat16)
    kn = (fk * inv_k).astype(jnp.bfloat16)

    # Cosine-similarity logits; contract feature axes directly (no .T copy),
    # bf16 MXU operands with f32 accumulation, additive mask bias (0 / -1e30).
    logits = lax.dot_general(qn, kn, (((1,), (1,)), ((), ())),
                             preferred_element_type=jnp.float32)
    logits = logits + bias_ref[...].astype(jnp.float32)

    # Online (flash-style) softmax over the source-node axis.  Masked entries
    # underflow to exactly 0 after the exp; a fully-masked tile contributes
    # garbage that is scaled to 0 as soon as a real (self-loop) entry appears.
    m_prev = m_sc[...]
    m_new = jnp.maximum(m_prev, jnp.max(logits, axis=-1, keepdims=True))
    scale = jnp.exp(m_prev - m_new)
    p = jnp.exp(logits - m_new)
    l_sc[...] = scale * l_sc[...] + jnp.sum(p, axis=-1, keepdims=True)
    acc_sc[...] = scale * acc_sc[...] + lax.dot_general(
        p.astype(jnp.bfloat16), fk.astype(jnp.bfloat16),
        (((1,), (0,)), ((), ())), preferred_element_type=jnp.float32)
    m_sc[...] = m_new

    @pl.when(j == pl.num_programs(1) - 1)
    def _():
        inv_l = pl.reciprocal(l_sc[...], approx=True)   # EUP, off the VALU path
        o_ref[...] = (acc_sc[...] * inv_l).astype(o_ref.dtype)


def agnn_prop(feat, bias, beta, *, tile_r=LANE, tile_c=LANE):
    n, h = feat.shape
    grid = (n // tile_r, n // tile_c)
    return pl.pallas_call(
        agnn_prop_kernel,
        out_shape=jax.ShapeDtypeStruct((n, h), jnp.float32),
        grid_spec=pltpu.PrefetchScalarGridSpec(
            num_scalar_prefetch=0,
            grid=grid,
            in_specs=[
                pl.BlockSpec((1, 1), lambda i, j: (0, 0)),            # beta
                pl.BlockSpec((tile_r, h), lambda i, j: (i, 0)),       # query rows
                pl.BlockSpec((tile_c, h), lambda i, j: (j, 0)),       # source rows
                pl.BlockSpec((tile_r, tile_c), lambda i, j: (i, j)),  # mask bias
            ],
            out_specs=pl.BlockSpec((tile_r, h), lambda i, j: (i, 0)),
            scratch_shapes=[pltpu.VMEM((tile_r, 1), jnp.float32),   # running max
                            pltpu.VMEM((tile_r, 1), jnp.float32),   # running sum
                            pltpu.VMEM((tile_r, h), jnp.float32)]), # accumulator
        compiler_params=pltpu.CompilerParams(
            dimension_semantics=("parallel", "arbitrary"),
            vmem_limit_bytes=_vmem_limit(4, tile_r * h * 4, tile_c * h * 4,
                                         tile_r * tile_c * 2, tile_r * h * 4)),
        cost_estimate=pl.CostEstimate(
            flops=int(4 * n * n * h),
            transcendentals=int(n * n + 4 * n),
            bytes_accessed=int(2 * n * n + 4 * (2 * (n // tile_r) + 2) * n * h)),
    )(beta, feat, feat, bias)


# ----------------------- lin2 + log_softmax ---------------------------------
def lin_logsoftmax_kernel(x_ref, w_ref, b_ref, o_ref):
    z = jnp.dot(x_ref[...], w_ref[...],
                preferred_element_type=jnp.float32) + b_ref[...]
    zmax = jnp.max(z, axis=-1, keepdims=True)
    zs = z - zmax
    lse = jnp.log(jnp.sum(jnp.exp(zs), axis=-1, keepdims=True))
    o_ref[...] = (zs - lse).astype(o_ref.dtype)


def lin_logsoftmax(x, w_t_pad, b_pad, *, tile_rows=LANE):
    n, h = x.shape
    cp = w_t_pad.shape[1]    # lane-dense padded class dim (128)
    return pl.pallas_call(
        lin_logsoftmax_kernel,
        out_shape=jax.ShapeDtypeStruct((n, cp), jnp.float32),
        grid_spec=pltpu.PrefetchScalarGridSpec(
            num_scalar_prefetch=0,
            grid=(n // tile_rows,),
            in_specs=[pl.BlockSpec((tile_rows, h), lambda i: (i, 0)),
                      pl.BlockSpec((h, cp), lambda i: (0, 0)),
                      pl.BlockSpec((1, cp), lambda i: (0, 0))],
            out_specs=pl.BlockSpec((tile_rows, cp), lambda i: (i, 0))),
        compiler_params=pltpu.CompilerParams(
            dimension_semantics=("parallel",),
            vmem_limit_bytes=_vmem_limit(tile_rows * h * 4, h * cp * 4,
                                         cp * 4, tile_rows * cp * 4)),
        cost_estimate=pl.CostEstimate(
            flops=int(2 * n * h * cp + 5 * n * cp),
            transcendentals=int(n * cp),
            bytes_accessed=int(4 * (n * h + h * cp + cp + n * cp))),
    )(x, w_t_pad, b_pad)


# ----------------------------- full forward ---------------------------------
def net_agnn_forward(x, w1_t, b1, adj_mask, beta2, w2_t, b2, *, tile=LANE):
    """x: [N,F]; adj_mask: [N,N] with adj[i,j]=1 iff edge j->i (self-loops
    included); weights pre-transposed to [in,out]."""
    n, f = x.shape
    h = w1_t.shape[1]
    c = w2_t.shape[1]
    n_pad = ((n + tile - 1) // tile) * tile
    c_pad = LANE

    # Pad the node axis to the tile size.  Padded nodes get a self-loop so
    # their softmax denominator stays finite; their -1e30 bias toward real
    # targets keeps them from influencing real rows (sliced off at the end).
    x_p = jnp.zeros((n_pad, f), jnp.float32).at[:n].set(x)
    bias = jnp.full((n_pad, n_pad), NEG_INF, jnp.float32)
    bias = bias.at[:n, :n].set(jnp.where(adj_mask > 0, 0.0, NEG_INF))
    pad_ids = jnp.arange(n, n_pad)
    bias = bias.at[pad_ids, pad_ids].set(0.0)
    bias = bias.astype(jnp.bfloat16)      # halve HBM bytes of the N^2 operand

    # lin2 params padded to a lane-dense 128-wide class slab; padded classes
    # get a -1e30 bias so the in-kernel log_softmax over 128 lanes equals the
    # log_softmax over the C real classes.
    w2_p = jnp.zeros((h, c_pad), jnp.float32).at[:, :c].set(w2_t)
    b2_p = jnp.full((1, c_pad), NEG_INF, jnp.float32).at[:, :c].set(b2)

    beta1 = jnp.ones((1, 1), jnp.float32)  # AGNNConv(requires_grad=False): beta == 1

    # TODO(synk): F.dropout(training=True) is stochastic; implemented as
    # identity (eval-time semantics).
    h0 = lin_relu(x_p, w1_t, b1, tile_rows=tile)             # relu(lin1(x))
    x1 = agnn_prop(h0, bias, beta1, tile_r=tile, tile_c=tile)  # prop1 (beta=1)
    x2 = agnn_prop(x1, bias, beta2, tile_r=tile, tile_c=tile)  # prop2 (learnable)
    logp = lin_logsoftmax(x2, w2_p, b2_p, tile_rows=tile)      # lin2 + log_softmax
    return logp[:n, :c], x1[:n]


# ------------------------------ reference -----------------------------------
def reference_forward(x, w1_t, b1, adj_mask, beta2, w2_t, b2):
    """Plain-JAX f32 reference of the same math (dense masked softmax)."""
    h = jnp.maximum(x @ w1_t + b1, 0.0)

    def prop(feat, beta):
        norm = jnp.sqrt(jnp.sum(feat * feat, axis=-1, keepdims=True))
        fn = feat / jnp.maximum(norm, 1e-12)
        logits = beta * (fn @ fn.T)
        logits = jnp.where(adj_mask > 0, logits, NEG_INF)
        m = jnp.max(logits, axis=-1, keepdims=True)
        e = jnp.exp(logits - m) * adj_mask
        alpha = e / jnp.sum(e, axis=-1, keepdims=True)
        return alpha @ feat

    x1 = prop(h, 1.0)
    x2 = prop(x1, beta2[0, 0])
    z = x2 @ w2_t + b2
    return jax.nn.log_softmax(z, axis=1), x1


if __name__ == "__main__":
    # Small synthetic "Citeseer-like" problem (non-multiple of 128 to exercise
    # the padding path; 2x2 tile grid in the attention kernels).
    N = 200        # nodes
    F_IN = 64      # dataset.num_features (toy)
    HID = 16       # lin1 out / AGNN hidden
    C = 6          # dataset.num_classes (Citeseer has 6)

    key = jax.random.PRNGKey(0)
    k_x, k_adj, k_w1, k_b1, k_w2, k_b2 = jax.random.split(key, 6)

    x = jax.random.normal(k_x, (N, F_IN), dtype=jnp.float32)

    # Synthetic edge_index -> dense mask [target, source], symmetric + self
    # loops (AGNNConv adds self-loops before propagation).
    a = (jax.random.uniform(k_adj, (N, N)) < 0.05).astype(jnp.float32)
    adj_mask = jnp.clip(a + a.T + jnp.eye(N, dtype=jnp.float32), 0.0, 1.0)

    # torch.nn.Linear weight is [out, in]; we pass the transpose [in, out].
    lim1 = 1.0 / np.sqrt(F_IN)
    w1_t = jax.random.uniform(k_w1, (F_IN, HID), minval=-lim1, maxval=lim1,
                              dtype=jnp.float32)
    b1 = jax.random.uniform(k_b1, (1, HID), minval=-lim1, maxval=lim1,
                            dtype=jnp.float32)
    lim2 = 1.0 / np.sqrt(HID)
    w2_t = jax.random.uniform(k_w2, (HID, C), minval=-lim2, maxval=lim2,
                              dtype=jnp.float32)
    b2 = jax.random.uniform(k_b2, (1, C), minval=-lim2, maxval=lim2,
                            dtype=jnp.float32)
    beta2 = jnp.ones((1, 1), dtype=jnp.float32)   # AGNNConv(requires_grad=True) init

    log_probs, x1 = net_agnn_forward(x, w1_t, b1, adj_mask, beta2, w2_t, b2)
    jax.block_until_ready((log_probs, x1))

    ref_logp, ref_x1 = reference_forward(x, w1_t, b1, adj_mask, beta2, w2_t, b2)
    # Tolerances account for bf16 MXU operands + approx reciprocal in-kernel
    # (reference is exact f32).
    np.testing.assert_allclose(np.asarray(x1), np.asarray(ref_x1),
                               rtol=5e-2, atol=5e-2)
    np.testing.assert_allclose(np.asarray(log_probs), np.asarray(ref_logp),
                               rtol=5e-2, atol=5e-2)
    assert log_probs.shape == (N, C) and x1.shape == (N, HID)

    print("KERNEL_OK")
</pallas_src>

<mosaic_0001>
module attributes {stable_mosaic.version = 11 : i64} {
  func.func @lin_relu_kernel(%arg0: i32, %arg1: memref<128x64xf32, #tpu.memory_space<vmem>>, %arg2: memref<64x16xf32, #tpu.memory_space<vmem>>, %arg3: memref<1x16xf32, #tpu.memory_space<vmem>>, %arg4: memref<128x16xf32, #tpu.memory_space<vmem>>) attributes {dimension_semantics = [#tpu.dimension_semantics<parallel>], iteration_bounds = array<i64: 2>, scalar_prefetch = 0 : i64, scratch_operands = 0 : i64, tpu.core_type = #tpu.core_type<tc>, window_params = [{transform_indices = @transform_0, window_bounds = array<i64: 128, 64>}, {pipeline_mode = #tpu.pipeline_mode<synchronous>, transform_indices = @transform_1, window_bounds = array<i64: 64, 16>}, {pipeline_mode = #tpu.pipeline_mode<synchronous>, transform_indices = @transform_2, window_bounds = array<i64: 1, 16>}, {transform_indices = @transform_3, window_bounds = array<i64: 128, 16>}]} {
    %c0 = arith.constant 0 : index
    %c0_0 = arith.constant 0 : index
    %0 = vector.load %arg1[%c0, %c0_0] : memref<128x64xf32, #tpu.memory_space<vmem>>, vector<128x64xf32>
    %c0_1 = arith.constant 0 : index
    %c0_2 = arith.constant 0 : index
    %1 = vector.load %arg2[%c0_1, %c0_2] : memref<64x16xf32, #tpu.memory_space<vmem>>, vector<64x16xf32>
    %cst = arith.constant dense<0.000000e+00> : vector<128x16xf32>
    %2 = tpu.matmul %0, %1, %cst {dimension_numbers = #tpu.dot_dimension_numbers<[1], [0], [0], [1], [0, 0, 1, 1], [], []>} : vector<128x64xf32>, vector<64x16xf32>, vector<128x16xf32> -> vector<128x16xf32>
    %c0_3 = arith.constant 0 : index
    %c0_4 = arith.constant 0 : index
    %3 = vector.load %arg3[%c0_3, %c0_4] : memref<1x16xf32, #tpu.memory_space<vmem>>, vector<1x16xf32>
    %4 = vector.broadcast %3 : vector<1x16xf32> to vector<128x16xf32>
    %5 = arith.addf %2, %4 : vector<128x16xf32>
    %cst_5 = arith.constant 0.000000e+00 : f32
    %6 = vector.broadcast %cst_5 : f32 to vector<128x16xf32>
    %7 = arith.maximumf %5, %6 : vector<128x16xf32>
    %c0_6 = arith.constant 0 : index
    %c0_7 = arith.constant 0 : index
    %8 = vector.load %arg4[%c0_6, %c0_7] : memref<128x16xf32, #tpu.memory_space<vmem>>, vector<128x16xf32>
    tpu.vector_store %arg4[%c0_6, %c0_7], %7 {strides = array<i32>} : memref<128x16xf32, #tpu.memory_space<vmem>>, vector<128x16xf32>,
    return
  }
  func.func @transform_0(%arg0: i32) -> (i32, i32) {
    %c0_i32 = arith.constant 0 : i32
    %c0_i32_0 = arith.constant 0 : i32
    return %arg0, %c0_i32 : i32, i32
  }
  func.func @transform_1(%arg0: i32) -> (i32, i32) {
    %c0_i32 = arith.constant 0 : i32
    %c0_i32_0 = arith.constant 0 : i32
    %c0_i32_1 = arith.constant 0 : i32
    return %c0_i32, %c0_i32_0 : i32, i32
  }
  func.func @transform_2(%arg0: i32) -> (i32, i32) {
    %c0_i32 = arith.constant 0 : i32
    %c0_i32_0 = arith.constant 0 : i32
    %c0_i32_1 = arith.constant 0 : i32
    return %c0_i32, %c0_i32_0 : i32, i32
  }
  func.func @transform_3(%arg0: i32) -> (i32, i32) {
    %c0_i32 = arith.constant 0 : i32
    %c0_i32_0 = arith.constant 0 : i32
    return %arg0, %c0_i32 : i32, i32
  }
}

</mosaic_0001>

<bundles_post_ra>
// kernel: tpu_custom_call.1
= control target key start
LH: loop header
LB: loop body
LE: loop exit
PB: predicated region body
PF: predicated region fallthrough
CT: control target
= control target key end

     0   :  { %s632_s12 = smov 0   ;;  %s751_s0 = inlined_call_operand.vmem [shape: f32[256,64], index: 0, kind: input, shape index: {}]   ;;  %s752_s1 = inlined_call_operand.vmem [shape: f32[64,16], index: 1, kind: input, shape index: {}]   ;;  %s753_s2 = inlined_call_operand.vmem [shape: f32[1,16], index: 2, kind: input, shape index: {}]   ;;  %s754_s3 = inlined_call_operand.vmem [shape: f32[256,16], index: 3, kind: output, shape index: {}]  }
   0x1 LB: > { %s488_s13 = sadd.s32 4294967295, %s610_s12   ;;  %p492_p0 = scmp.ge.s32.totalorder %s610_s12, 1  ;;  %s610_s12 = sphi %s632_s12, %s13_s12  }
   0x2   : > { %p138_p1 = scmp.lt.s32.totalorder %s610_s12, 3 }
   0x4   : > { %p139_p2 = pnand %p492_p0, %p138_p1 }
   0x5   : > { %s493_s18 = sshll.u32 (!%p139_p2), %s488_s13, 4 }
   0x6   : > { %142 = sbr.rel (%p139_p2) target bundleno = 241 (0xf1), region = 32  ;;  %p163_p3 = scmp.lt.s32.totalorder (!%p139_p2), %s493_s18, 31 }
   0xb   : > { %v197_v0 = vld [vmem:[%s752_s1 + $0x38] sm:$0xff]  ;;  %v196_v1 = vld [vmem:[%s752_s1 + $0x30] sm:$0xff]  ;;  %v195_v2 = vld [vmem:[%s752_s1 + $0x28] sm:$0xff]  ;;  %s756_s18 = smov (!%p163_p3, %s493_s18), 31  ;;  %vm205_vm0 = vcmask 523264   ;;  %vm415_vm1 = vcmask 130048  }
   0xc   : > { %540 = vmatprep.subr.mxu0 %v197_v0  ;;  %580 = vmatprep.subr.mxu1 %v197_v0  ;;  %v194_v3 = vld [vmem:[%s752_s1 + $0x20] sm:$0xff]  ;;  %v193_v4 = vld [vmem:[%s752_s1 + $0x18] sm:$0xff]  ;;  %v192_v5 = vld [vmem:[%s752_s1 + $0x10] sm:$0xff]  ;;  %s494_s27 = sshll.u32 %s756_s18, 3 }
   0xd   : > { %541 = vmatpush3.msra.mxu0 %v197_v0  ;;  %588 = vmatpush3.msra.mxu1 %v197_v0  ;;  %v191_v6 = vld [vmem:[%s752_s1 + $0x8] sm:$0xff]  ;;  %s669_s5 = scalar_lea.vmem %s751_s0, %s494_s27  ;;  %v190_v7 = vld [vmem:[%s752_s1] sm:$0xff]  ;;  %s714_s13 = scalar_lea.vmem %s754_s3, %s494_s27 }
   0xe   : > { %542 = vmatprep.subr.mxu0 %v196_v1  ;;  %581 = vmatprep.subr.mxu1 %v196_v1  ;;  %v174_v8 = vld [vmem:[%s669_s5] sm:$0xff]  ;;  %v175_v10 = vld [vmem:[%s669_s5 + $0x8] sm:$0xff]  ;;  %v176_v12 = vld [vmem:[%s669_s5 + $0x10] sm:$0xff] }
   0xf   : > { %543 = vmatpush3.msra.mxu0 %v196_v1  ;;  %589 = vmatpush3.msra.mxu1 %v196_v1  ;;  %v182_v9 = vld [vmem:[%s669_s5 + $0x40] sm:$0xff]  ;;  %v183_v11 = vld [vmem:[%s669_s5 + $0x48] sm:$0xff]  ;;  %v184_v13 = vld [vmem:[%s669_s5 + $0x50] sm:$0xff] }
  0x10   : > { %544 = vmatprep.subr.mxu0 %v195_v2  ;;  %582 = vmatprep.subr.mxu1 %v195_v2  ;;  %v177_v14 = vld [vmem:[%s669_s5 + $0x18] sm:$0xff]  ;;  %v178_v16 = vld [vmem:[%s669_s5 + $0x20] sm:$0xff]  ;;  %v179_v18 = vld [vmem:[%s669_s5 + $0x28] sm:$0xff] }
  0x11   : > { %545 = vmatpush3.msra.mxu0 %v195_v2  ;;  %590 = vmatpush3.msra.mxu1 %v195_v2  ;;  %v185_v15 = vld [vmem:[%s669_s5 + $0x58] sm:$0xff]  ;;  %v186_v17 = vld [vmem:[%s669_s5 + $0x60] sm:$0xff]  ;;  %v187_v19 = vld [vmem:[%s669_s5 + $0x68] sm:$0xff] }
  0x12   : > { %546 = vmatprep.subr.mxu0 %v194_v3  ;;  %583 = vmatprep.subr.mxu1 %v194_v3  ;;  %v180_v20 = vld [vmem:[%s669_s5 + $0x30] sm:$0xff]  ;;  %v181_v22 = vld [vmem:[%s669_s5 + $0x38] sm:$0xff]  ;;  %v497_v24 = vld [vmem:[%s753_s2] ss:$0 sm:$0xff] }
  0x13   : > { %547 = vmatpush3.msra.mxu0 %v194_v3  ;;  %591 = vmatpush3.msra.mxu1 %v194_v3  ;;  %v188_v21 = vld [vmem:[%s669_s5 + $0x70] sm:$0xff]  ;;  %v189_v23 = vld [vmem:[%s669_s5 + $0x78] sm:$0xff] }
  0x14   : > { %548 = vmatprep.subr.mxu0 %v193_v4  ;;  %584 = vmatprep.subr.mxu1 %v193_v4 }
  0x15   : > { %549 = vmatpush3.msra.mxu0 %v193_v4  ;;  %592 = vmatpush3.msra.mxu1 %v193_v4 }
  0x16   : > { %550 = vmatprep.subr.mxu0 %v192_v5  ;;  %585 = vmatprep.subr.mxu1 %v192_v5 }
  0x17   : > { %551 = vmatpush3.msra.mxu0 %v192_v5  ;;  %593 = vmatpush3.msra.mxu1 %v192_v5 }
  0x18   : > { %552 = vmatprep.subr.mxu0 %v191_v6  ;;  %586 = vmatprep.subr.mxu1 %v191_v6 }
  0x19   : > { %553 = vmatpush3.msra.mxu0 %v191_v6  ;;  %594 = vmatpush3.msra.mxu1 %v191_v6 }
  0x1a   : > { %554 = vmatprep.subr.mxu0 %v190_v7  ;;  %587 = vmatprep.subr.mxu1 %v190_v7 }
  0x1b   : > { %555 = vmatpush3.msra.mxu0 %v190_v7  ;;  %595 = vmatpush3.msra.mxu1 %v190_v7 }
  0x1c   : > { %556 = vmatprep.mubr.msk.f32.mxu0 %vm205_vm0, %v174_v8  ;;  %568 = vmatprep.mubr.msk.f32.mxu1 %vm205_vm0, %v182_v9 }
  0x1d   : > { %557 = vmatmul.mubr.msk.f32.vlgmr.msra.gmra.mxu0 %vm205_vm0, %v175_v10  ;;  %569 = vmatmul.mubr.msk.f32.vlgmr.msra.gmra.mxu1 %vm205_vm0, %v183_v11 }
  0x1e   : > { %559 = vmatprep.mubr.msk.f32.mxu0 %vm205_vm0, %v176_v12  ;;  %571 = vmatprep.mubr.msk.f32.mxu1 %vm205_vm0, %v184_v13 }
  0x21   : > { %560 = vmatmul.mubr.msk.f32.gmra.mxu0 %vm205_vm0, %v177_v14  ;;  %572 = vmatmul.mubr.msk.f32.gmra.mxu1 %vm205_vm0, %v185_v15 }
  0x22   : > { %562 = vmatprep.mubr.msk.f32.mxu0 %vm205_vm0, %v178_v16  ;;  %574 = vmatprep.mubr.msk.f32.mxu1 %vm205_vm0, %v186_v17 }
  0x25   : > { %563 = vmatmul.mubr.msk.f32.gmra.mxu0 %vm205_vm0, %v179_v18  ;;  %575 = vmatmul.mubr.msk.f32.gmra.mxu1 %vm205_vm0, %v187_v19 }
  0x26   : > { %565 = vmatprep.mubr.msk.f32.mxu0 %vm205_vm0, %v180_v20  ;;  %577 = vmatprep.mubr.msk.f32.mxu1 %vm205_vm0, %v188_v21 }
  0x29   : > { %566 = vmatmul.mubr.msk.f32.gmra.mxu0 %vm205_vm0, %v181_v22  ;;  %578 = vmatmul.mubr.msk.f32.gmra.mxu1 %vm205_vm0, %v189_v23 }
  0xdd   : > { %v558_v25 = vpop.f32.mrf.mxu0  ;;  %v570_v26 = vpop.f32.mrf.mxu1 }
  0xde   : > { %v326_v27 = vadd.f32 %v558_v25, %v497_v24  ;;  %v366_v28 = vadd.f32 %v570_v26, %v497_v24 }
  0xdf   : > { %v320_v29 = vpop.f32.mrf.mxu0  ;;  %v360_v30 = vpop.f32.mrf.mxu1 }
  0xe0   : > { %v400_v31 = vmax.f32 %v326_v27, 0.0  ;;  %v408_v32 = vmax.f32 %v366_v28, 0.0  ;;  %v321_v33 = vadd.f32 %v497_v24, %v320_v29  ;;  %v361_v34 = vadd.f32 %v497_v24, %v360_v30 }
  0xe1   : > { %v561_v35 = vpop.f32.mrf.mxu0  ;;  %v573_v36 = vpop.f32.mrf.mxu1 }
  0xe2   : > { %417 = vst.msk [vmem:[%s714_s13 + $0x8] sm:$0xff] %vm415_vm1, %v400_v31  ;;  %425 = vst.msk [vmem:[%s714_s13 + $0x48] sm:$0xff] %vm415_vm1, %v408_v32  ;;  %v399_v37 = vmax.f32 %v321_v33, 0.0  ;;  %v407_v38 = vmax.f32 %v361_v34, 0.0  ;;  %v336_v39 = vadd.f32 %v561_v35, %v497_v24  ;;  %v376_v40 = vadd.f32 %v573_v36, %v497_v24 }
  0xe3   : > { %v330_v41 = vpop.f32.mrf.mxu0  ;;  %v370_v42 = vpop.f32.mrf.mxu1 }
  0xe4   : > { %416 = vst.msk [vmem:[%s714_s13] sm:$0xff] %vm415_vm1, %v399_v37  ;;  %424 = vst.msk [vmem:[%s714_s13 + $0x40] sm:$0xff] %vm415_vm1, %v407_v38  ;;  %v402_v43 = vmax.f32 %v336_v39, 0.0  ;;  %v410_v44 = vmax.f32 %v376_v40, 0.0  ;;  %v331_v45 = vadd.f32 %v497_v24, %v330_v41  ;;  %v371_v46 = vadd.f32 %v497_v24, %v370_v42 }
  0xe5   : > { %v564_v47 = vpop.f32.mrf.mxu0  ;;  %v576_v48 = vpop.f32.mrf.mxu1 }
  0xe6   : > { %419 = vst.msk [vmem:[%s714_s13 + $0x18] sm:$0xff] %vm415_vm1, %v402_v43  ;;  %427 = vst.msk [vmem:[%s714_s13 + $0x58] sm:$0xff] %vm415_vm1, %v410_v44  ;;  %v401_v49 = vmax.f32 %v331_v45, 0.0  ;;  %v409_v50 = vmax.f32 %v371_v46, 0.0  ;;  %v346_v51 = vadd.f32 %v564_v47, %v497_v24  ;;  %v386_v52 = vadd.f32 %v576_v48, %v497_v24 }
  0xe7   : > { %v340_v53 = vpop.f32.mrf.mxu0  ;;  %v380_v54 = vpop.f32.mrf.mxu1 }
  0xe8   : > { %418 = vst.msk [vmem:[%s714_s13 + $0x10] sm:$0xff] %vm415_vm1, %v401_v49  ;;  %426 = vst.msk [vmem:[%s714_s13 + $0x50] sm:$0xff] %vm415_vm1, %v409_v50  ;;  %v404_v55 = vmax.f32 %v346_v51, 0.0  ;;  %v412_v56 = vmax.f32 %v386_v52, 0.0  ;;  %v341_v57 = vadd.f32 %v497_v24, %v340_v53  ;;  %v381_v58 = vadd.f32 %v497_v24, %v380_v54 }
  0xe9   : > { %v567_v59 = vpop.f32.mrf.mxu0  ;;  %v579_v60 = vpop.f32.mrf.mxu1 }
  0xea   : > { %421 = vst.msk [vmem:[%s714_s13 + $0x28] sm:$0xff] %vm415_vm1, %v404_v55  ;;  %429 = vst.msk [vmem:[%s714_s13 + $0x68] sm:$0xff] %vm415_vm1, %v412_v56  ;;  %v403_v61 = vmax.f32 %v341_v57, 0.0  ;;  %v411_v62 = vmax.f32 %v381_v58, 0.0  ;;  %v356_v63 = vadd.f32 %v567_v59, %v497_v24  ;;  %v396_v0 = vadd.f32 %v579_v60, %v497_v24 }
  0xeb   : > { %v350_v1 = vpop.f32.mrf.mxu0  ;;  %v390_v2 = vpop.f32.mrf.mxu1 }
  0xec   : > { %420 = vst.msk [vmem:[%s714_s13 + $0x20] sm:$0xff] %vm415_vm1, %v403_v61  ;;  %428 = vst.msk [vmem:[%s714_s13 + $0x60] sm:$0xff] %vm415_vm1, %v411_v62  ;;  %v406_v3 = vmax.f32 %v356_v63, 0.0  ;;  %v414_v4 = vmax.f32 %v396_v0, 0.0  ;;  %v351_v5 = vadd.f32 %v497_v24, %v350_v1  ;;  %v391_v6 = vadd.f32 %v497_v24, %v390_v2 }
  0xee   : > { %423 = vst.msk [vmem:[%s714_s13 + $0x38] sm:$0xff] %vm415_vm1, %v406_v3  ;;  %431 = vst.msk [vmem:[%s714_s13 + $0x78] sm:$0xff] %vm415_vm1, %v414_v4  ;;  %v405_v7 = vmax.f32 %v351_v5, 0.0  ;;  %v413_v8 = vmax.f32 %v391_v6, 0.0 }
  0xf0   : > { %422 = vst.msk [vmem:[%s714_s13 + $0x30] sm:$0xff] %vm415_vm1, %v405_v7  ;;  %430 = vst.msk [vmem:[%s714_s13 + $0x70] sm:$0xff] %vm415_vm1, %v413_v8 }
  0xf1 PF: > { %s13_s12 = sadd.s32 1, %s610_s12  }
  0xf2   : > { %p10_p4 = scmp.ge.s32.totalorder %s13_s12, 4  }
  0xf4   :  { %12 = sbr.rel (!%p10_p4) target bundleno = 1 (0x1), region = 62 }

</bundles_post_ra>
